<compile_context>
chip_gen: v6e
topology: v6e:2x2x1
jax: 0.10.0
libtpu: 0.0.40
codegen_flags: <defaults>
</compile_context>

<pallas_src>
import functools

import jax
import jax.numpy as jnp
from jax.experimental import pallas as pl
from jax.experimental.pallas import tpu as pltpu

LN_EPS = 1e-5


def _decoder_rescat_kernel(x_ref, wcat_ref, bcat_ref, gamma_ref, beta_ref,
                           wfh_ref, o_ref, *, hidden, hidden_pad, mxu_dtype):
    x = x_ref[...]                                              # (tm, in_f)
    if mxu_dtype is not None:
        x = x.astype(mxu_dtype)

    # Single merged MXU push over the shared-x matmuls:
    #   cat = x @ [W1_pad | Wfx] + [b1_pad | bf]   (f32 accumulate)
    cat = jnp.dot(x, wcat_ref[...], preferred_element_type=jnp.float32)
    cat = cat + bcat_ref[...].astype(jnp.float32)

    h_raw = cat[:, :hidden_pad]       # (tm, hidden_pad); padded cols are exactly 0
    fx = cat[:, hidden_pad:]          # (tm, out_f) = x @ Wfx + bf

    # LayerNorm over the true `hidden` features.  Single-pass statistics so the
    # zero-padded columns contribute nothing to either sum.
    inv_h = 1.0 / float(hidden)
    mean = jnp.sum(h_raw, axis=-1, keepdims=True) * inv_h
    ex2 = jnp.sum(h_raw * h_raw, axis=-1, keepdims=True) * inv_h
    var = jnp.maximum(ex2 - mean * mean, 0.0)
    h = (h_raw - mean) * jax.lax.rsqrt(var + LN_EPS)
    # gamma/beta are zero-padded -> padded columns become exactly 0 after affine.
    h = h * gamma_ref[...].astype(jnp.float32) + beta_ref[...].astype(jnp.float32)
    h = jnp.maximum(h, 0.0)

    h = h.astype(mxu_dtype if mxu_dtype is not None else wfh_ref.dtype)
    out = fx + jnp.dot(h, wfh_ref[...], preferred_element_type=jnp.float32)

    o_ref[...] = out.astype(o_ref.dtype)


@functools.partial(jax.jit, static_argnames=("tm", "use_bf16_mxu"))
def decoder_rescat(x, params, *, tm=1024, use_bf16_mxu=True):
    """x: [..., in_features] -> [..., out_features]."""
    w1, b1, gamma, beta, wfx, wfh, bf = params
    in_f, hidden = w1.shape
    out_f = wfx.shape[1]

    lead_shape = x.shape[:-1]
    x2 = x.reshape(-1, in_f)
    n = x2.shape[0]

    # Zero-pad hidden up to a 128-lane boundary so splitting the merged
    # x @ [W1 | Wfx] product is relayout-free.  Padding is inert (zeros).
    hidden_pad = pl.cdiv(hidden, 128) * 128
    hp = hidden_pad - hidden
    w1p = jnp.pad(w1, ((0, 0), (0, hp)))
    b1p = jnp.pad(b1, ((0, 0), (0, hp)))
    gammap = jnp.pad(gamma, ((0, 0), (0, hp)))
    betap = jnp.pad(beta, ((0, 0), (0, hp)))
    wfhp = jnp.pad(wfh, ((0, hp), (0, 0)))

    wcat = jnp.concatenate([w1p, wfx], axis=1)      # (in_f, hidden_pad + out_f)
    bcat = jnp.concatenate([b1p, bf], axis=1)       # (1, hidden_pad + out_f)

    mxu_dtype = jnp.bfloat16 if use_bf16_mxu else None
    if mxu_dtype is not None:
        wcat = wcat.astype(mxu_dtype)
        wfhp = wfhp.astype(mxu_dtype)

    # Balanced row tiles; force >= 2 blocks when n >= 16 so v7x's two TensorCores
    # both get work.  No wrapper padding: the tail block is masked by Pallas.
    n_blocks = pl.cdiv(n, tm)
    if n >= 16:
        n_blocks = max(n_blocks, 2)
    tm_eff = pl.cdiv(pl.cdiv(n, n_blocks), 8) * 8
    grid = (pl.cdiv(n, tm_eff),)

    kernel = functools.partial(
        _decoder_rescat_kernel,
        hidden=hidden, hidden_pad=hidden_pad, mxu_dtype=mxu_dtype)

    out = pl.pallas_call(
        kernel,
        out_shape=jax.ShapeDtypeStruct((n, out_f), x.dtype),
        grid_spec=pltpu.PrefetchScalarGridSpec(
            num_scalar_prefetch=0,
            grid=grid,
            in_specs=[
                pl.BlockSpec((tm_eff, in_f), lambda i: (i, 0)),               # x rows
                pl.BlockSpec((in_f, hidden_pad + out_f), lambda i: (0, 0)),   # [W1 | Wfx]
                pl.BlockSpec((1, hidden_pad + out_f), lambda i: (0, 0)),      # [b1 | bf]
                pl.BlockSpec((1, hidden_pad), lambda i: (0, 0)),              # LN gamma
                pl.BlockSpec((1, hidden_pad), lambda i: (0, 0)),              # LN beta
                pl.BlockSpec((hidden_pad, out_f), lambda i: (0, 0)),          # Wfh
            ],
            out_specs=pl.BlockSpec((tm_eff, out_f), lambda i: (i, 0)),
        ),
        compiler_params=pltpu.CompilerParams(
            dimension_semantics=("parallel",)),
    )(x2, wcat, bcat, gammap, betap, wfhp)

    return out.reshape(*lead_shape, out_f)


def init_params(key, in_features, hidden_size, out_features, dtype=jnp.float32):
    """Deterministic synthetic parameters (layouts pre-transposed for x @ W)."""
    k1, k2, k3, k4 = jax.random.split(key, 4)
    w1 = (jax.random.normal(k1, (in_features, hidden_size), jnp.float32) * 0.05).astype(dtype)
    b1 = (jax.random.normal(k2, (1, hidden_size), jnp.float32) * 0.05).astype(dtype)
    gamma = jnp.ones((1, hidden_size), dtype)
    beta = jnp.zeros((1, hidden_size), dtype)
    # fc acts on cat([x, mlp(x)]); split into x-part and mlp-part.
    wfx = (jax.random.normal(k3, (in_features, out_features), jnp.float32) * 0.05).astype(dtype)
    wfh = (jax.random.normal(k4, (hidden_size, out_features), jnp.float32) * 0.05).astype(dtype)
    bf = jnp.zeros((1, out_features), dtype)
    return (w1, b1, gamma, beta, wfx, wfh, bf)


def decoder_rescat_ref(x, params):
    """Pure-JAX reference of the PyTorch forward."""
    w1, b1, gamma, beta, wfx, wfh, bf = params
    h = x @ w1 + b1
    mean = jnp.mean(h, axis=-1, keepdims=True)
    var = jnp.mean((h - mean) ** 2, axis=-1, keepdims=True)
    h = (h - mean) / jnp.sqrt(var + LN_EPS)
    h = jnp.maximum(h * gamma + beta, 0.0)
    return x @ wfx + h @ wfh + bf


if __name__ == "__main__":
    batch, seq = 2, 8
    in_features, hidden_size, out_features = 32, 64, 60

    key = jax.random.PRNGKey(0)
    kx, kp = jax.random.split(key)
    x = jax.random.normal(kx, (batch, seq, in_features), jnp.float32)
    params = init_params(kp, in_features, hidden_size, out_features)

    ref = decoder_rescat_ref(x, params)

    # Exact-semantics path (native f32 on the MXU).
    out_f32 = jax.block_until_ready(decoder_rescat(x, params, use_bf16_mxu=False))
    assert out_f32.shape == (batch, seq, out_features), out_f32.shape
    assert jnp.allclose(out_f32, ref, atol=1e-4, rtol=1e-4), float(
        jnp.max(jnp.abs(out_f32 - ref)))

    # Default fast path (bf16 MXU feed, f32 accumulate) — looser tolerance.
    out_fast = jax.block_until_ready(decoder_rescat(x, params))
    assert out_fast.shape == (batch, seq, out_features), out_fast.shape
    assert jnp.allclose(out_fast, ref, atol=3e-2, rtol=3e-2), float(
        jnp.max(jnp.abs(out_fast - ref)))

    # Non-dividing N: exercises the in-kernel tail-block masking (no pad copy).
    x_odd = jax.random.normal(kx, (13, in_features), jnp.float32)
    out_odd = jax.block_until_ready(
        decoder_rescat(x_odd, params, tm=8, use_bf16_mxu=False))
    ref_odd = decoder_rescat_ref(x_odd, params)
    assert out_odd.shape == (13, out_features), out_odd.shape
    assert jnp.allclose(out_odd, ref_odd, atol=1e-4, rtol=1e-4), float(
        jnp.max(jnp.abs(out_odd - ref_odd)))

    print("KERNEL_OK")
</pallas_src>

<mosaic_0001>
module attributes {stable_mosaic.version = 11 : i64} {
  func.func @_decoder_rescat_kernel(%arg0: i32, %arg1: memref<8x32xf32, #tpu.memory_space<vmem>>, %arg2: memref<32x188xf32, #tpu.memory_space<vmem>>, %arg3: memref<1x188xf32, #tpu.memory_space<vmem>>, %arg4: memref<1x128xf32, #tpu.memory_space<vmem>>, %arg5: memref<1x128xf32, #tpu.memory_space<vmem>>, %arg6: memref<128x60xf32, #tpu.memory_space<vmem>>, %arg7: memref<8x60xf32, #tpu.memory_space<vmem>>) attributes {dimension_semantics = [#tpu.dimension_semantics<parallel>], iteration_bounds = array<i64: 2>, scalar_prefetch = 0 : i64, scratch_operands = 0 : i64, tpu.core_type = #tpu.core_type<tc>, window_params = [{transform_indices = @transform_0, window_bounds = array<i64: 8, 32>}, {pipeline_mode = #tpu.pipeline_mode<synchronous>, transform_indices = @transform_1, window_bounds = array<i64: 32, 188>}, {pipeline_mode = #tpu.pipeline_mode<synchronous>, transform_indices = @transform_2, window_bounds = array<i64: 1, 188>}, {pipeline_mode = #tpu.pipeline_mode<synchronous>, transform_indices = @transform_3, window_bounds = array<i64: 1, 128>}, {pipeline_mode = #tpu.pipeline_mode<synchronous>, transform_indices = @transform_4, window_bounds = array<i64: 1, 128>}, {pipeline_mode = #tpu.pipeline_mode<synchronous>, transform_indices = @transform_5, window_bounds = array<i64: 128, 60>}, {transform_indices = @transform_6, window_bounds = array<i64: 8, 60>}]} {
    %c0 = arith.constant 0 : index
    %c0_0 = arith.constant 0 : index
    %0 = vector.load %arg1[%c0, %c0_0] : memref<8x32xf32, #tpu.memory_space<vmem>>, vector<8x32xf32>
    %c0_1 = arith.constant 0 : index
    %c0_2 = arith.constant 0 : index
    %1 = vector.load %arg2[%c0_1, %c0_2] : memref<32x188xf32, #tpu.memory_space<vmem>>, vector<32x188xf32>
    %cst = arith.constant dense<0.000000e+00> : vector<8x188xf32>
    %2 = tpu.matmul %0, %1, %cst {dimension_numbers = #tpu.dot_dimension_numbers<[1], [0], [0], [1], [0, 0, 1, 1], [], []>} : vector<8x32xf32>, vector<32x188xf32>, vector<8x188xf32> -> vector<8x188xf32>
    %c0_3 = arith.constant 0 : index
    %c0_4 = arith.constant 0 : index
    %3 = vector.load %arg3[%c0_3, %c0_4] : memref<1x188xf32, #tpu.memory_space<vmem>>, vector<1x188xf32>
    %4 = vector.broadcast %3 : vector<1x188xf32> to vector<8x188xf32>
    %5 = arith.addf %2, %4 : vector<8x188xf32>
    %6 = vector.extract_strided_slice %5 {offsets = [0, 0], sizes = [8, 128], strides = [1, 1]} : vector<8x188xf32> to vector<8x128xf32>
    %7 = vector.extract_strided_slice %5 {offsets = [0, 128], sizes = [8, 60], strides = [1, 1]} : vector<8x188xf32> to vector<8x60xf32>
    %cst_5 = arith.constant dense<0.000000e+00> : vector<8xf32>
    %8 = vector.multi_reduction <add>, %6, %cst_5 [1] : vector<8x128xf32> to vector<8xf32>
    %9 = vector.shape_cast %8 : vector<8xf32> to vector<8x1xf32>
    %cst_6 = arith.constant 1.562500e-02 : f32
    %10 = vector.broadcast %cst_6 : f32 to vector<8x1xf32>
    %11 = arith.mulf %9, %10 : vector<8x1xf32>
    %12 = arith.mulf %6, %6 : vector<8x128xf32>
    %cst_7 = arith.constant dense<0.000000e+00> : vector<8xf32>
    %13 = vector.multi_reduction <add>, %12, %cst_7 [1] : vector<8x128xf32> to vector<8xf32>
    %14 = vector.shape_cast %13 : vector<8xf32> to vector<8x1xf32>
    %cst_8 = arith.constant 1.562500e-02 : f32
    %15 = vector.broadcast %cst_8 : f32 to vector<8x1xf32>
    %16 = arith.mulf %14, %15 : vector<8x1xf32>
    %17 = arith.mulf %11, %11 : vector<8x1xf32>
    %18 = arith.subf %16, %17 : vector<8x1xf32>
    %cst_9 = arith.constant 0.000000e+00 : f32
    %19 = vector.broadcast %cst_9 : f32 to vector<8x1xf32>
    %20 = arith.maximumf %18, %19 : vector<8x1xf32>
    %21 = vector.broadcast %11 : vector<8x1xf32> to vector<8x128xf32>
    %22 = arith.subf %6, %21 : vector<8x128xf32>
    %cst_10 = arith.constant 9.99999974E-6 : f32
    %23 = vector.broadcast %cst_10 : f32 to vector<8x1xf32>
    %24 = arith.addf %20, %23 : vector<8x1xf32>
    %25 = math.rsqrt %24 : vector<8x1xf32>
    %26 = vector.broadcast %25 : vector<8x1xf32> to vector<8x128xf32>
    %27 = arith.mulf %22, %26 : vector<8x128xf32>
    %c0_11 = arith.constant 0 : index
    %c0_12 = arith.constant 0 : index
    %28 = vector.load %arg4[%c0_11, %c0_12] : memref<1x128xf32, #tpu.memory_space<vmem>>, vector<1x128xf32>
    %29 = vector.broadcast %28 : vector<1x128xf32> to vector<8x128xf32>
    %30 = arith.mulf %27, %29 : vector<8x128xf32>
    %c0_13 = arith.constant 0 : index
    %c0_14 = arith.constant 0 : index
    %31 = vector.load %arg5[%c0_13, %c0_14] : memref<1x128xf32, #tpu.memory_space<vmem>>, vector<1x128xf32>
    %32 = vector.broadcast %31 : vector<1x128xf32> to vector<8x128xf32>
    %33 = arith.addf %30, %32 : vector<8x128xf32>
    %cst_15 = arith.constant 0.000000e+00 : f32
    %34 = vector.broadcast %cst_15 : f32 to vector<8x128xf32>
    %35 = arith.maximumf %33, %34 : vector<8x128xf32>
    %c0_16 = arith.constant 0 : index
    %c0_17 = arith.constant 0 : index
    %36 = vector.load %arg6[%c0_16, %c0_17] : memref<128x60xf32, #tpu.memory_space<vmem>>, vector<128x60xf32>
    %cst_18 = arith.constant dense<0.000000e+00> : vector<8x60xf32>
    %37 = tpu.matmul %35, %36, %cst_18 {dimension_numbers = #tpu.dot_dimension_numbers<[1], [0], [0], [1], [0, 0, 1, 1], [], []>} : vector<8x128xf32>, vector<128x60xf32>, vector<8x60xf32> -> vector<8x60xf32>
    %38 = arith.addf %7, %37 : vector<8x60xf32>
    %c0_19 = arith.constant 0 : index
    %c0_20 = arith.constant 0 : index
    %39 = vector.load %arg7[%c0_19, %c0_20] : memref<8x60xf32, #tpu.memory_space<vmem>>, vector<8x60xf32>
    tpu.vector_store %arg7[%c0_19, %c0_20], %38 {strides = array<i32>} : memref<8x60xf32, #tpu.memory_space<vmem>>, vector<8x60xf32>,
    return
  }
  func.func @transform_0(%arg0: i32) -> (i32, i32) {
    %c0_i32 = arith.constant 0 : i32
    %c0_i32_0 = arith.constant 0 : i32
    return %arg0, %c0_i32 : i32, i32
  }
  func.func @transform_1(%arg0: i32) -> (i32, i32) {
    %c0_i32 = arith.constant 0 : i32
    %c0_i32_0 = arith.constant 0 : i32
    %c0_i32_1 = arith.constant 0 : i32
    return %c0_i32, %c0_i32_0 : i32, i32
  }
  func.func @transform_2(%arg0: i32) -> (i32, i32) {
    %c0_i32 = arith.constant 0 : i32
    %c0_i32_0 = arith.constant 0 : i32
    %c0_i32_1 = arith.constant 0 : i32
    return %c0_i32, %c0_i32_0 : i32, i32
  }
  func.func @transform_3(%arg0: i32) -> (i32, i32) {
    %c0_i32 = arith.constant 0 : i32
    %c0_i32_0 = arith.constant 0 : i32
    %c0_i32_1 = arith.constant 0 : i32
    return %c0_i32, %c0_i32_0 : i32, i32
  }
  func.func @transform_4(%arg0: i32) -> (i32, i32) {
    %c0_i32 = arith.constant 0 : i32
    %c0_i32_0 = arith.constant 0 : i32
    %c0_i32_1 = arith.constant 0 : i32
    return %c0_i32, %c0_i32_0 : i32, i32
  }
  func.func @transform_5(%arg0: i32) -> (i32, i32) {
    %c0_i32 = arith.constant 0 : i32
    %c0_i32_0 = arith.constant 0 : i32
    %c0_i32_1 = arith.constant 0 : i32
    return %c0_i32, %c0_i32_0 : i32, i32
  }
  func.func @transform_6(%arg0: i32) -> (i32, i32) {
    %c0_i32 = arith.constant 0 : i32
    %c0_i32_0 = arith.constant 0 : i32
    return %arg0, %c0_i32 : i32, i32
  }
}

</mosaic_0001>

<bundles_post_ra>
// kernel: decoder_rescat.1
= control target key start
LH: loop header
LB: loop body
LE: loop exit
PB: predicated region body
PF: predicated region fallthrough
CT: control target
= control target key end

     0   :  { %11 = vsyncpa [#allocation3], 0  ;;  %s950_s0 = inlined_call_operand.vmem [shape: f32[16,32], index: 0, kind: input, shape index: {}]   ;;  %s951_s1 = inlined_call_operand.vmem [shape: f32[32,188], index: 1, kind: input, shape index: {}]   ;;  %s952_s2 = inlined_call_operand.vmem [shape: f32[1,188], index: 2, kind: input, shape index: {}]   ;;  %s953_s3 = inlined_call_operand.vmem [shape: f32[1,128], index: 3, kind: input, shape index: {}]   ;;  %s954_s4 = inlined_call_operand.vmem [shape: f32[1,128], index: 4, kind: input, shape index: {}]   ;;  %s955_s5 = inlined_call_operand.vmem [shape: f32[128,60], index: 5, kind: input, shape index: {}]   ;;  %s956_s6 = inlined_call_operand.hbm [shape: f32[16,60], index: 6, kind: output, shape index: {}]  }
   0x1   :  { %13 = vsyncpa [#allocation3 + $0x1], 0  ;;  %s744_s21 = smov 0   ;;  %s746_s22 = smov 0  }
   0x2   :  { %s748_s23 = smov 0   ;;  %s750_s24 = smov 0  }
   0x3 LB: > { %s765_s25 = sadd.s32 4294967295, %s704_s24   ;;  %s536_s26 = sadd.s32 4294967294, %s704_s24   ;;  %s704_s24 = sphi %s750_s24, %s962_s24   ;;  %s700_s23 = sphi %s748_s23, %s961_s23   ;;  %s696_s22 = sphi %s746_s22, %s960_s22   ;;  %s692_s21 = sphi %s744_s21, %s959_s21  }
   0x4   : > { %s769_s27 = sadd.s32 1, %s704_s24   ;;  %s157_s28 = sadd.s32 1, %s700_s23 }
   0x5   : > { %s154_s29 = ssub.s32 %s704_s24, %s769_s27  ;;  %p167_p0 = scmp.ne.s32.totalorder %s700_s23, %s696_s22 }
   0x6   : > { %p155_p1 = scmp.eq.s32.totalorder %s154_s29, 0  ;;  %p168_p2 = scmp.eq.s32.totalorder %s765_s25, 1 }
   0x7   : > { %p173_p3 = scmp.ne.s32.totalorder %s696_s22, %s692_s21  ;;  %p174_p4 = scmp.eq.s32.totalorder %s536_s26, 1 }
   0x8   : > { %s780_s30 = scalar_select %p155_p1, %s700_s23, %s157_s28  }
   0x9   : > { %p782_p5 = por %p168_p2, %p167_p0  ;;  %p786_p6 = por %p174_p4, %p173_p3 }
   0xa   : > { %p539_p7 = scmp.ge.s32.totalorder %s704_s24, 1  ;;  %p214_p8 = scmp.lt.s32.totalorder %s704_s24, 3 }
   0xc   : > { %p215_p9 = pnand %p539_p7, %p214_p8 }
   0xd   : > { %p243_p10 = scmp.lt.s32.totalorder (!%p215_p9), %s765_s25, 1  ;;  %s240_s29 = sand.u32 (!%p215_p9), 1, %s696_s22  }
   0xe   : > { %218 = sbr.rel (%p215_p9) target bundleno = 603 (0x25b), region = 44  ;;  %s546_s10 = sshll.u32 (!%p215_p9), %s765_s25, 7 }
   0xf   : > { %s915_s15 = scalar_lea.hbm (!%p215_p9), %s956_s6, %s546_s10  ;;  %s464_s16 = scalar_lea.sflag (!%p215_p9), [#allocation3], %s240_s29 }
  0x13   : > { %v255_v0 = vld [vmem:[%s951_s1 + $0x38] sm:$0xff]  ;;  %v254_v1 = vld [vmem:[%s951_s1 + $0x30] sm:$0xff]  ;;  %v253_v2 = vld [vmem:[%s951_s1 + $0x28] sm:$0xff]  ;;  %v706_v4 = vmov 0.0   ;;  %s244_s19 = scalar_select %p243_p10, %s765_s25, 1  ;;  %vm268_vm0 = vcmask 261120   ;;  %v258_v10 = vlaneseq }
  0x14   : > { %296 = vmatprep.subr.mxu0 %v255_v0  ;;  %v252_v3 = vld [vmem:[%s951_s1 + $0x20] sm:$0xff]  ;;  %336 = vmatprep.mubr.f32.mxu0 %v706_v4  ;;  %v251_v5 = vld [vmem:[%s951_s1 + $0x18] sm:$0xff]  ;;  %v250_v6 = vld [vmem:[%s951_s1 + $0x10] sm:$0xff]  ;;  %vm707_vm1 = vmmov 0   ;;  %vm461_vm2 = vcmask 490496   ;;  %s708_s25 = smov [#allocation2]  }
  0x15   : > { %297 = vmatpush1.msra.mxu0 %v254_v1  ;;  %566 = vmatprep.subr.mxu1 %v706_v4  ;;  %v249_v7 = vld [vmem:[%s951_s1 + $0x8] sm:$0xff]  ;;  %s541_s9 = sshll.u32 %s244_s19, 3  ;;  %v248_v8 = vld [vmem:[%s951_s1] sm:$0xff]  ;;  %v823_v11 = vshrl.u32 %v258_v10, 7  ;;  %v389_v18 = vld [vmem:[%s955_s5 + $0x78] sm:$0xff]  ;;  %s648_s18 = sshll.u32 %s708_s25, 4  ;;  %s649_s18 = int_to_ptr.vmem [resolvable:$false] %s648_s18 }
  0x16   : > { %298 = vmatprep.subr.mxu0 %v253_v2  ;;  %s246_s14 = scalar_lea.vmem %s950_s0, %s541_s9  ;;  %v829_v13 = vld [vmem:[%s952_s2] sm:$0x3]  ;;  %567 = vmatpush3.msra.mxu1 %v389_v18  ;;  %v388_v19 = vld [vmem:[%s955_s5 + $0x70] sm:$0xff]  ;;  %v387_v20 = vld [vmem:[%s955_s5 + $0x68] sm:$0xff]  ;;  %s540_s9 = sshll.u32 %s240_s29, 3 }
  0x17   : > { %299 = vmatpush1.msra.mxu0 %v252_v3  ;;  %v247_v9 = vld [vmem:[%s246_s14] sm:$0xff]  ;;  %v260_v12 = vsub.s32 0, %v823_v11  ;;  %568 = vmatprep.subr.mxu1 %v706_v4  ;;  %v385_v22 = vld [vmem:[%s955_s5 + $0x58] sm:$0xff]  ;;  %v384_v23 = vld [vmem:[%s955_s5 + $0x50] sm:$0xff]  ;;  %v264_v50 = vsub.s32 1, %v823_v11  ;;  %s242_s11 = scalar_lea.vmem [#allocation2], %s540_s9 }
  0x18   : > { %300 = vmatprep.subr.mxu0 %v251_v5  ;;  %569 = vmatpush3.msra.mxu1 %v388_v19  ;;  %v386_v21 = vld [vmem:[%s955_s5 + $0x60] sm:$0xff]  ;;  %v383_v24 = vld [vmem:[%s955_s5 + $0x48] sm:$0xff]  ;;  %v381_v26 = vld [vmem:[%s955_s5 + $0x38] sm:$0xff]  ;;  %s477_s12 = sshll.u32 %s242_s11, 4  ;;  %s650_s19 = scalar_lea.vmem %s649_s18, 256  ;;  %s478_s12 = int_to_ptr.vmem [resolvable:$true] %s477_s12 }
  0x19   : > { %301 = vmatpush1.msra.mxu0 %v250_v6  ;;  %v261_v14 = vrot.slane %v829_v13, %v260_v12  ;;  %570 = vmatprep.subr.mxu1 %v706_v4  ;;  %v382_v25 = vld [vmem:[%s955_s5 + $0x40] sm:$0xff]  ;;  %v380_v27 = vld [vmem:[%s955_s5 + $0x30] sm:$0xff]  ;;  %v379_v28 = vld [vmem:[%s955_s5 + $0x28] sm:$0xff]  ;;  %v265_v51 = vrot.slane %v829_v13, %v264_v50  ;;  %s644_s17 = scalar_lea.vmem %s478_s12, 128  ;;  %p651_p0 = scmp.lt.s32.totalorder %s478_s12, %s649_s18 }
  0x1a   : > { %302 = vmatprep.subr.mxu0 %v249_v7  ;;  %571 = vmatpush3.msra.mxu1 %v387_v20  ;;  %v378_v29 = vld [vmem:[%s955_s5 + $0x20] sm:$0xff]  ;;  %v377_v30 = vld [vmem:[%s955_s5 + $0x18] sm:$0xff]  ;;  %v376_v31 = vld [vmem:[%s955_s5 + $0x10] sm:$0xff]  ;;  %p645_p11 = scmp.ne.s32.totalorder %s478_s12, %s644_s17  ;;  %p652_p1 = scmp.lt.s32.totalorder %s650_s19, %s644_s17 }
  0x1b   : > { %303 = vmatpush1.msra.mxu0 %v248_v8  ;;  %572 = vmatprep.subr.mxu1 %v706_v4  ;;  %v375_v32 = vld [vmem:[%s955_s5 + $0x8] sm:$0xff]  ;;  %v374_v33 = vld [vmem:[%s955_s5] sm:$0xff] }
  0x1c   : > { %542 = vmatmul.mubr.msk.f32.vlgmr.msra.gmra.mxu0 %vm268_vm0, %v247_v9  ;;  %573 = vmatpush3.msra.mxu1 %v386_v21  ;;  %v543_v44 = vld [vmem:[%s953_s3] ss:$0 sm:$0xff]  ;;  %p646_p12 = pnand %p645_p11, %p782_p5  ;;  %p653_p2 = por %p652_p1, %p651_p0 }
  0x1d   : > { %574 = vmatprep.subr.mxu1 %v706_v4  ;;  %598 = vmatprep.mubr.msk.f32.mxu1 %vm707_vm1, %v706_v4  ;;  %v544_v46 = vld [vmem:[%s954_s4] ss:$0 sm:$0xff] }
  0x1e   : > { %575 = vmatpush3.msra.mxu1 %v385_v22  ;;  %p647_p13 = pneg %p646_p12 }
  0x1f   : > { %576 = vmatprep.subr.mxu1 %v706_v4 }
  0x20   : > { %577 = vmatpush3.msra.mxu1 %v384_v23  ;;  %p654_p3 = pnand %p653_p2, %p647_p13 }
  0x21   : > { %578 = vmatprep.subr.mxu1 %v706_v4 }
  0x22   : > { %579 = vmatpush3.msra.mxu1 %v383_v24 }
  0x23   : > { %580 = vmatprep.subr.mxu1 %v706_v4 }
  0x24   : > { %581 = vmatpush3.msra.mxu1 %v382_v25 }
  0x25   : > { %582 = vmatprep.subr.mxu1 %v706_v4 }
  0x26   : > { %583 = vmatpush3.msra.mxu1 %v381_v26 }
  0x27   : > { %584 = vmatprep.subr.mxu1 %v706_v4 }
  0x28   : > { %585 = vmatpush3.msra.mxu1 %v380_v27 }
  0x29   : > { %586 = vmatprep.subr.mxu1 %v706_v4 }
  0x2a   : > { %587 = vmatpush3.msra.mxu1 %v379_v28 }
  0x2b   : > { %588 = vmatprep.subr.mxu1 %v706_v4 }
  0x2c   : > { %589 = vmatpush3.msra.mxu1 %v378_v29 }
  0x2d   : > { %590 = vmatprep.subr.mxu1 %v706_v4 }
  0x2e   : > { %591 = vmatpush3.msra.mxu1 %v377_v30 }
  0x2f   : > { %592 = vmatprep.subr.mxu1 %v706_v4 }
  0x30   : > { %593 = vmatpush3.msra.mxu1 %v376_v31 }
  0x31   : > { %594 = vmatprep.subr.mxu1 %v706_v4 }
  0x32   : > { %595 = vmatpush3.msra.mxu1 %v375_v32 }
  0x33   : > { %596 = vmatprep.subr.mxu1 %v706_v4 }
  0x34   : > { %597 = vmatpush3.msra.mxu1 %v374_v33 }
  0xdc   : > { %v338_v15 = vpop.f32.mrf.mxu0 }
  0xdd   : > { %v832_v16 = vadd.f32 %v338_v15, %v261_v14 }
  0xde   : > { %v340_v52 = vpop.f32.mrf.mxu0 }
  0xdf   : > { %343 = vadd.xlane.f32.xlu0 %v832_v16  ;;  %v346_v17 = vmul.f32 %v832_v16, %v832_v16  ;;  %v341_v53 = vadd.f32 %v340_v52, %v265_v51 }
  0xe3   : > { %347 = vadd.xlane.f32.xlu0 %v346_v17 }
 0x168   : > { %v344_v34 = vpop.xlane.xlu0 %343 }
 0x169   : > { %v345_v35 = vmul.f32 0.015625, %v344_v34 }
 0x16b   : > { %v350_v37 = vmul.f32 %v345_v35, %v345_v35  ;;  %v353_v42 = vsub.f32 %v832_v16, %v345_v35 }
 0x16c   : > { %v348_v36 = vpop.xlane.xlu0 %347 }
 0x16d   : > { %v349_v38 = vmul.f32 0.015625, %v348_v36 }
 0x16f   : > { %v351_v39 = vsub.f32 %v349_v38, %v350_v37 }
 0x171   : > { %v352_v40 = vmax.f32 %v351_v39, 0.0 }
 0x173   : > { %v354_v41 = vadd.f32 1e-05, %v352_v40 }
 0x175   : > { %642 = vrsqrt.f32 %v354_v41 }
 0x182   : > { %v643_v43 = vpop.eup %642 }
 0x183   : > { %v356_v45 = vmul.f32 %v643_v43, %v353_v42 }
 0x185   : > { %v364_v47 = vmul.f32 %v543_v44, %v356_v45 }
 0x187   : > { %v372_v48 = vadd.f32 %v544_v46, %v364_v47 }
 0x189   : > { %v373_v49 = vmax.f32 %v372_v48, 0.0 }
 0x18b   : > { %599 = vmatmul.mubr.f32.vlgmr.msra.gmra.mxu1 %v373_v49 }
 0x24b   : > { %v456_v54 = vpop.f32.mrf.mxu1 }
 0x24c   : > { %v460_v55 = vadd.f32 %v456_v54, %v341_v53 }
 0x24d   : > { %v600_v56 = vpop.f32.mrf.mxu1 }
 0x24e   : > { %462 = vst.msk [vmem:[%s242_s11] sm:$0xff] %vm461_vm2, %v460_v55 }
 0x24f   : > { %657 = shalt.err (!%p654_p3)
}
 0x250   : > { %s658_s20 = scalar_lea.hbm %s915_s15, 128  ;;  %s662_s29 = scalar_lea.hbm %s956_s6, 256 }
 0x251   : > { %p659_p4 = scmp.ne.s32.totalorder %s915_s15, %s658_s20  ;;  %p663_p9 = scmp.lt.s32.totalorder %s915_s15, %s956_s6 }
 0x252   : > { %p664_p10 = scmp.lt.s32.totalorder %s662_s29, %s658_s20 }
 0x253   : > { %p660_p7 = pnand %p659_p4, %p782_p5 }
 0x254   : > { %p665_p11 = por %p664_p10, %p663_p9 }
 0x255   : > { %p661_p8 = pneg %p660_p7 }
 0x257   : > { %p666_p12 = pnand %p665_p11, %p661_p8 }
 0x259   : > { %669 = shalt.err (!%p666_p12)
}
 0x25a   : > { %601 = dma.vmem_to_hbm [thread:$0]  (%p782_p5), %s478_s12, 128, %s915_s15, %s464_s16  }
 0x25b PF: > { %p607_p13 = scmp.ge.s32.totalorder %s704_s24, 2  ;;  %s489_s11 = sand.u32 1, %s692_s21  }
 0x25c   : > { %s490_s13 = scalar_lea.sflag [#allocation3], %s489_s11 }
 0x25d   : > { %p604_p0 = pnand %p607_p13, %p786_p6 }
 0x25f   : > { %p605_p1 = pneg %p604_p0 }
 0x261   : > { %687 = dma.done.wait (%p605_p1), %s490_s13, 128  }
 0x262   : > { %689 = vsyncadd (%p605_p1), %s490_s13, 4294967168  ;;  %p16_p2 = scmp.ge.s32.totalorder %s769_s27, 4   ;;  %s959_s21 = smov %s696_s22 }
 0x263   : > { %s960_s22 = smov %s700_s23  ;;  %s961_s23 = smov %s780_s30 }
 0x264   : > { %s962_s24 = smov %s769_s27  ;;  %18 = sbr.rel (!%p16_p2) target bundleno = 3 (0x3), region = 79 }
 0x269   :  { %495 = vsyncpa [#allocation3], 1 }
 0x26a   :  { %497 = vsyncpa [#allocation3 + $0x1], 1 }

</bundles_post_ra>
